<compile_context>
chip_gen: v7x
topology: tpu7x:2x2x1
jax: 0.10.0
libtpu: 0.0.40
codegen_flags: <defaults>
</compile_context>

<pallas_src>
import functools

import jax
import jax.numpy as jnp
from jax import lax
from jax.experimental import pallas as pl
from jax.experimental.pallas import tpu as pltpu

_GRANULE = 32    # row granularity: multiple of sublane packing for f32/bf16/int8
_ACC_ROWS = 32   # f32 scratch accumulator height (4 vregs at D=128)


def _avg_gamma_kernel(n_ref, x_ref, o_ref, acc_ref, *, tiles_per_core, n_tiles):
    """Streaming row-mean.

    n_ref:   (1,) int32 scalar-prefetch (SMEM) -- true number of rows N.
    x_ref:   (tn, D) input tile in VMEM.
    o_ref:   (1, 1, D) float32 resident per-core partial output (already * 1/N).
    acc_ref: (_ACC_ROWS, D) float32 scratch accumulator.
    """
    c = pl.program_id(0)               # core / split index ("parallel")
    i = pl.program_id(1)               # step within this core ("arbitrary")
    n = n_ref[0]
    tn, d = x_ref.shape
    t = c * tiles_per_core + i         # logical (unclamped) tile index

    @pl.when(i == 0)
    def _init():
        acc_ref[...] = jnp.zeros_like(acc_ref)

    x = x_ref[...].astype(jnp.float32)
    is_full = (t + 1) * tn <= n        # every row of this tile is a real row

    @pl.when(is_full)
    def _accumulate_full():
        # Split the sublane dim, reduce the leading (vreg-index) dim: pure VPU adds.
        acc_ref[...] += jnp.sum(x.reshape(tn // _ACC_ROWS, _ACC_ROWS, d), axis=0)

    @pl.when(jnp.logical_not(is_full))
    def _accumulate_masked():
        # Ragged tail (or a clamped duplicate tile past the end): OOB rows are NOT
        # guaranteed zero by Pallas -- mask them explicitly against the true N.
        rows = lax.broadcasted_iota(jnp.int32, (tn, d), 0)
        valid = n - t * tn             # <= 0 for fully-masked duplicate tiles
        xm = jnp.where(rows < valid, x, 0.0)
        acc_ref[...] += jnp.sum(xm.reshape(tn // _ACC_ROWS, _ACC_ROWS, d), axis=0)

    @pl.when(i == pl.num_programs(1) - 1)
    def _finalize():
        # Single cross-sublane (XLU) reduce + scale by 1/N_true.
        s = jnp.sum(acc_ref[...], axis=0)              # (D,)
        inv_n = 1.0 / n.astype(jnp.float32)
        o_ref[...] = (s * inv_n).reshape(1, 1, d)


def _round_up(v, m):
    return -(-v // m) * m


def _tpu_generation():
    try:
        kind = jax.devices()[0].device_kind.lower()
    except Exception:
        return 0
    for g in (7, 6, 5, 4, 3):
        if f"v{g}" in kind:
            return g
    return 0


def avg_gamma(x, *, tile_n=None, num_splits=None, vmem_budget_bytes=None):
    """x: (N, D) float array. Returns mean over dim -2, shape (D,), dtype of x."""
    x = jnp.asarray(x)
    if x.ndim != 2:
        raise ValueError(f"AvgGamma expects a 2-D (n, 128)-like input, got {x.shape}")
    if not jnp.issubdtype(x.dtype, jnp.floating):
        raise TypeError("AvgGamma (torch.mean) requires a floating-point input")
    N, D = x.shape
    itemsize = jnp.dtype(x.dtype).itemsize

    gen = _tpu_generation()
    if tile_n is None:
        tile_n = 8192 if gen >= 6 else 4096          # v6e/v7x: 4 MiB f32 blocks at D=128
    if num_splits is None:
        num_splits = 2 if gen >= 7 else 1            # v7x has 2 TensorCores per chip
    if vmem_budget_bytes is None:
        vmem_budget_bytes = (24 << 20) if gen >= 6 else (12 << 20)

    # Only the degenerate tiny-N case pads (< 32 rows copied; negligible).
    if N < _GRANULE:
        x = jnp.pad(x, ((0, _GRANULE - N), (0, 0)))
    n_rows = x.shape[0]

    # Tile height: multiple of _GRANULE, <= n_rows (block starts always in bounds),
    # and double-buffered input block footprint within the VMEM budget.
    max_tn_rows = (n_rows // _GRANULE) * _GRANULE
    max_tn_vmem = max(_GRANULE,
                      (vmem_budget_bytes // (2 * D * itemsize)) // _GRANULE * _GRANULE)
    tn = max(_GRANULE, min(_round_up(tile_n, _GRANULE), max_tn_rows, max_tn_vmem))

    n_tiles = pl.cdiv(n_rows, tn)
    num_cores = max(1, min(num_splits, n_tiles))
    steps = pl.cdiv(n_tiles, num_cores)              # grid steps per core

    kernel = functools.partial(
        _avg_gamma_kernel, tiles_per_core=steps, n_tiles=n_tiles)

    def x_index_map(c, i, n_ref):
        # Clamp so trailing duplicate steps re-read the last tile (then fully masked).
        return (jnp.minimum(c * steps + i, n_tiles - 1), 0)

    def o_index_map(c, i, n_ref):
        return (c, 0, 0)                             # resident across the reduction axis

    footprint = 2 * tn * D * itemsize + _ACC_ROWS * D * 4 + 2 * D * 4
    compiler_kwargs = dict(dimension_semantics=("parallel", "arbitrary"))
    if footprint > (12 << 20):                       # exceed only when we actually need it
        compiler_kwargs["vmem_limit_bytes"] = int(footprint + (4 << 20))

    n_arr = jnp.array([N], dtype=jnp.int32)          # true N, prefetched into SMEM

    partials = pl.pallas_call(
        kernel,
        out_shape=jax.ShapeDtypeStruct((num_cores, 1, D), jnp.float32),
        grid_spec=pltpu.PrefetchScalarGridSpec(
            num_scalar_prefetch=1,
            grid=(num_cores, steps),
            in_specs=[pl.BlockSpec((tn, D), x_index_map)],
            out_specs=pl.BlockSpec((1, 1, D), o_index_map),
            scratch_shapes=[pltpu.VMEM((_ACC_ROWS, D), jnp.float32)],
        ),
        compiler_params=pltpu.CompilerParams(**compiler_kwargs),
    )(n_arr, x)

    # Combine per-core partials (each already scaled by 1/N) and cast back.
    return jnp.sum(partials[:, 0, :], axis=0).astype(x.dtype)


if __name__ == "__main__":
    D = 128

    # Case 1: the module's nominal (n, 128) input at small n.
    N = 16
    x = jax.random.normal(jax.random.PRNGKey(0), (N, D), dtype=jnp.float32)
    y = avg_gamma(x)
    jax.block_until_ready(y)
    y_ref = jnp.mean(x, axis=-2)
    assert y.shape == (D,) and y.dtype == x.dtype
    assert bool(jnp.allclose(y, y_ref, atol=1e-5, rtol=1e-5)), "small-N mismatch"

    # Case 2: multi-tile + ragged N + 2-way split (v7x code path; sequential but
    # correct on 1-TC chips). Exercises full, partial, and duplicate-masked tiles.
    N2 = 2600
    x2 = jax.random.normal(jax.random.PRNGKey(1), (N2, D), dtype=jnp.float32)
    y2 = avg_gamma(x2, tile_n=1024, num_splits=2)
    jax.block_until_ready(y2)
    y2_ref = jnp.mean(x2, axis=-2)
    assert y2.shape == (D,)
    assert bool(jnp.allclose(y2, y2_ref, atol=2e-5, rtol=1e-5)), "tiled/ragged-N mismatch"

    # Case 3: auto-tuned defaults (big tile, ragged tail of only a few rows).
    y3 = avg_gamma(x2)
    jax.block_until_ready(y3)
    assert bool(jnp.allclose(y3, y2_ref, atol=2e-5, rtol=1e-5)), "default-path mismatch"

    print("KERNEL_OK")
</pallas_src>

<mosaic_0001>
module attributes {stable_mosaic.version = 11 : i64} {
  func.func @_avg_gamma_kernel(%arg0: i32, %arg1: i32, %arg2: memref<1xi32, #tpu.memory_space<smem>>, %arg3: memref<32x128xf32, #tpu.memory_space<vmem>>, %arg4: memref<1x1x128xf32, #tpu.memory_space<vmem>>, %arg5: memref<32x128xf32, #tpu.memory_space<vmem>>) attributes {dimension_semantics = [#tpu.dimension_semantics<parallel>, #tpu.dimension_semantics<arbitrary>], iteration_bounds = array<i64: 1, 1>, scalar_prefetch = 1 : i64, scratch_operands = 1 : i64, tpu.core_type = #tpu.core_type<tc>, window_params = [{transform_indices = @transform_0, window_bounds = array<i64: 32, 128>}, {transform_indices = @transform_1, window_bounds = array<i64: 1, 1, 128>}]} {
    %c0 = arith.constant 0 : index
    %0 = memref.load %arg2[%c0] : memref<1xi32, #tpu.memory_space<smem>>
    %c1_i32 = arith.constant 1 : i32
    %1 = arith.muli %arg0, %c1_i32 : i32
    %2 = arith.addi %1, %arg1 : i32
    %c0_i32 = arith.constant 0 : i32
    %3 = arith.cmpi eq, %arg1, %c0_i32 : i32
    %4 = arith.extui %3 : i1 to i32
    %c0_i32_0 = arith.constant 0 : i32
    %5 = arith.cmpi ne, %4, %c0_i32_0 : i32
    scf.if %5 {
      %cst = arith.constant 0.000000e+00 : f32
      %18 = vector.broadcast %cst : f32 to vector<32x128xf32>
      %c0_8 = arith.constant 0 : index
      %c0_9 = arith.constant 0 : index
      %19 = vector.load %arg5[%c0_8, %c0_9] : memref<32x128xf32, #tpu.memory_space<vmem>>, vector<32x128xf32>
      tpu.vector_store %arg5[%c0_8, %c0_9], %18 {strides = array<i32>} : memref<32x128xf32, #tpu.memory_space<vmem>>, vector<32x128xf32>,
    } else {
    }
    %c0_1 = arith.constant 0 : index
    %c0_2 = arith.constant 0 : index
    %6 = vector.load %arg3[%c0_1, %c0_2] : memref<32x128xf32, #tpu.memory_space<vmem>>, vector<32x128xf32>
    %c1_i32_3 = arith.constant 1 : i32
    %7 = arith.addi %2, %c1_i32_3 : i32
    %c32_i32 = arith.constant 32 : i32
    %8 = arith.muli %7, %c32_i32 : i32
    %9 = arith.cmpi sle, %8, %0 : i32
    %10 = arith.extui %9 : i1 to i32
    %c0_i32_4 = arith.constant 0 : i32
    %11 = arith.cmpi ne, %10, %c0_i32_4 : i32
    scf.if %11 {
      %c0_8 = arith.constant 0 : index
      %c0_9 = arith.constant 0 : index
      %18 = vector.load %arg5[%c0_8, %c0_9] : memref<32x128xf32, #tpu.memory_space<vmem>>, vector<32x128xf32>
      %19 = vector.shape_cast %6 : vector<32x128xf32> to vector<1x32x128xf32>
      %cst = arith.constant dense<0.000000e+00> : vector<32x128xf32>
      %20 = vector.multi_reduction <add>, %19, %cst [0] : vector<1x32x128xf32> to vector<32x128xf32>
      %21 = arith.addf %18, %20 : vector<32x128xf32>
      %c0_10 = arith.constant 0 : index
      %c0_11 = arith.constant 0 : index
      %22 = vector.load %arg5[%c0_10, %c0_11] : memref<32x128xf32, #tpu.memory_space<vmem>>, vector<32x128xf32>
      tpu.vector_store %arg5[%c0_10, %c0_11], %21 {strides = array<i32>} : memref<32x128xf32, #tpu.memory_space<vmem>>, vector<32x128xf32>,
    } else {
    }
    %true = arith.constant true
    %12 = arith.xori %9, %true : i1
    %13 = arith.extui %12 : i1 to i32
    %c0_i32_5 = arith.constant 0 : i32
    %14 = arith.cmpi ne, %13, %c0_i32_5 : i32
    scf.if %14 {
      %18 = tpu.iota {dimensions = array<i32: 0>} : vector<32x128xi32>
      %c32_i32_8 = arith.constant 32 : i32
      %19 = arith.muli %2, %c32_i32_8 : i32
      %20 = arith.subi %0, %19 : i32
      %21 = vector.broadcast %20 : i32 to vector<32x128xi32>
      %22 = arith.cmpi slt, %18, %21 : vector<32x128xi32>
      %cst = arith.constant 0.000000e+00 : f32
      %23 = vector.broadcast %cst : f32 to vector<32x128xf32>
      %24 = arith.select %22, %6, %23 : vector<32x128xi1>, vector<32x128xf32>
      %c0_9 = arith.constant 0 : index
      %c0_10 = arith.constant 0 : index
      %25 = vector.load %arg5[%c0_9, %c0_10] : memref<32x128xf32, #tpu.memory_space<vmem>>, vector<32x128xf32>
      %26 = vector.shape_cast %24 : vector<32x128xf32> to vector<1x32x128xf32>
      %cst_11 = arith.constant dense<0.000000e+00> : vector<32x128xf32>
      %27 = vector.multi_reduction <add>, %26, %cst_11 [0] : vector<1x32x128xf32> to vector<32x128xf32>
      %28 = arith.addf %25, %27 : vector<32x128xf32>
      %c0_12 = arith.constant 0 : index
      %c0_13 = arith.constant 0 : index
      %29 = vector.load %arg5[%c0_12, %c0_13] : memref<32x128xf32, #tpu.memory_space<vmem>>, vector<32x128xf32>
      tpu.vector_store %arg5[%c0_12, %c0_13], %28 {strides = array<i32>} : memref<32x128xf32, #tpu.memory_space<vmem>>, vector<32x128xf32>,
    } else {
    }
    %c0_i32_6 = arith.constant 0 : i32
    %15 = arith.cmpi eq, %arg1, %c0_i32_6 : i32
    %16 = arith.extui %15 : i1 to i32
    %c0_i32_7 = arith.constant 0 : i32
    %17 = arith.cmpi ne, %16, %c0_i32_7 : i32
    scf.if %17 {
      %c0_8 = arith.constant 0 : index
      %c0_9 = arith.constant 0 : index
      %18 = vector.load %arg5[%c0_8, %c0_9] : memref<32x128xf32, #tpu.memory_space<vmem>>, vector<32x128xf32>
      %cst = arith.constant dense<0.000000e+00> : vector<128xf32>
      %19 = vector.multi_reduction <add>, %18, %cst [0] : vector<32x128xf32> to vector<128xf32>
      %20 = arith.sitofp %0 : i32 to f32
      %cst_10 = arith.constant 1.000000e+00 : f32
      %21 = arith.divf %cst_10, %20 : f32
      %22 = vector.broadcast %21 : f32 to vector<128xf32>
      %23 = arith.mulf %19, %22 : vector<128xf32>
      %24 = vector.shape_cast %23 : vector<128xf32> to vector<1x1x128xf32>
      %c0_11 = arith.constant 0 : index
      %c0_12 = arith.constant 0 : index
      %c0_13 = arith.constant 0 : index
      %25 = vector.load %arg4[%c0_11, %c0_12, %c0_13] : memref<1x1x128xf32, #tpu.memory_space<vmem>>, vector<1x1x128xf32>
      tpu.vector_store %arg4[%c0_11, %c0_12, %c0_13], %24 {strides = array<i32>} : memref<1x1x128xf32, #tpu.memory_space<vmem>>, vector<1x1x128xf32>,
    } else {
    }
    return
  }
  func.func @transform_0(%arg0: i32, %arg1: i32, %arg2: memref<1xi32, #tpu.memory_space<smem>>) -> (i32, i32) {
    %c1_i32 = arith.constant 1 : i32
    %0 = arith.muli %arg0, %c1_i32 : i32
    %1 = arith.addi %0, %arg1 : i32
    %c0_i32 = arith.constant 0 : i32
    %2 = arith.minsi %1, %c0_i32 : i32
    %c0_i32_0 = arith.constant 0 : i32
    %c0_i32_1 = arith.constant 0 : i32
    return %2, %c0_i32_0 : i32, i32
  }
  func.func @transform_1(%arg0: i32, %arg1: i32, %arg2: memref<1xi32, #tpu.memory_space<smem>>) -> (i32, i32, i32) {
    %c0_i32 = arith.constant 0 : i32
    %c0_i32_0 = arith.constant 0 : i32
    %c0_i32_1 = arith.constant 0 : i32
    return %arg0, %c0_i32, %c0_i32_0 : i32, i32, i32
  }
}

</mosaic_0001>

<bundles_post_ra>
// kernel: tpu_custom_call.1
= control target key start
LH: loop header
LB: loop body
LE: loop exit
PB: predicated region body
PF: predicated region fallthrough
CT: control target
= control target key end

     0   :  { %8 = vsyncpa [#allocation6], 0  ;;  %s264_s0 = inlined_call_operand.<no memory space> [shape: s32[1], index: 0, kind: input, shape index: {}]   ;;  %s265_s1 = inlined_call_operand.hbm [shape: f32[32,128], index: 1, kind: input, shape index: {}]   ;;  %s266_s2 = inlined_call_operand.hbm [shape: f32[1,1,128], index: 2, kind: output, shape index: {}]  }
   0x1   :  { %9 = vsyncpa [#allocation7], 0  ;;  %s208_s9 = smov [#allocation5]   ;;  %s160_s13 = scalar_lea.hbm %s265_s1, 512 }
   0x2   :  { %s21_s10 = sshll.u32 %s208_s9, 4  ;;  %p161_p0 = scmp.ne.s32.totalorder %s265_s1, %s160_s13  ;;  %s22_s10 = int_to_ptr.vmem [resolvable:$true] %s21_s10 }
   0x3   :  { %p164_p1 = scmp.lt.u32.totalorder %s160_s13, %s265_s1 }
   0x5   :  { %p166_p2 = pnand %p164_p1, %p161_p0 }
   0x7   :  { %169 = shalt.err (!%p166_p2)
}
   0x8   :  { %s170_s18 = scalar_lea.vmem %s22_s10, 512  ;;  %p175_p4 = scmp.lt.s32.totalorder %s22_s10, %s22_s10 }
   0x9   :  { %p171_p3 = scmp.ne.s32.totalorder %s22_s10, %s170_s18  ;;  %p176_p5 = scmp.lt.s32.totalorder %s170_s18, %s170_s18 }
   0xb   :  { %p177_p6 = por %p176_p5, %p175_p4 }
   0xd   :  { %p178_p7 = pnand %p177_p6, %p171_p3 }
   0xf   :  { %181 = shalt.err (!%p178_p7)
}
  0x10   :  { %s209_s19 = smov 128   ;;  %s210_s20 = smov 8  }
  0x11   :  { %27 = dma.hbm_to_vmem [thread:$0]  %s265_s1, 512, %s22_s10, [#allocation6], %s209_s19, %s209_s19, %s210_s20  }
  0x12   :  { %204 = dma.done.wait [#allocation6], 512  }
  0x13   :  { %205 = vsyncadd [#allocation6], 4294966784  ;;  %v211_v0 = vmov 0.0   ;;  %v45_v1 = vld [vmem:[#allocation5] sm:$0xff]  ;;  %v46_v2 = vld [vmem:[#allocation5 + $0x8] sm:$0xff]  ;;  %p148_p8 = scmp.lt.s32.totalorder %s264_s0, 32 }
  0x14   :  { %41 = vst [vmem:[#allocation2] sm:$0xff] %v211_v0  ;;  %42 = vst [vmem:[#allocation2 + $0x8] sm:$0xff] %v211_v0  ;;  %v47_v3 = vld [vmem:[#allocation5 + $0x10] sm:$0xff]  ;;  %v48_v4 = vld [vmem:[#allocation5 + $0x18] sm:$0xff] }
  0x15   :  { %43 = vst [vmem:[#allocation2 + $0x10] sm:$0xff] %v211_v0  ;;  %44 = vst [vmem:[#allocation2 + $0x18] sm:$0xff] %v211_v0  ;;  %54 = sbr.rel (%p148_p8) target bundleno = 32 (0x20), region = 17 }
  0x1b   :  { %v55_v5 = vld [vmem:[#allocation2] sm:$0xff] (!%p148_p8)  ;;  %v56_v6 = vld [vmem:[#allocation2 + $0x8] sm:$0xff] (!%p148_p8) }
  0x1c   :  { %v57_v7 = vld [vmem:[#allocation2 + $0x10] sm:$0xff]  ;;  %v63_v8 = vadd.f32 %v55_v5, %v45_v1  ;;  %v64_v9 = vadd.f32 %v56_v6, %v46_v2  ;;  %v58_v11 = vld [vmem:[#allocation2 + $0x18] sm:$0xff] }
  0x1d   :  { %v65_v10 = vadd.f32 %v57_v7, %v47_v3  ;;  %v66_v12 = vadd.f32 %v58_v11, %v48_v4 }
  0x1e   :  { %67 = vst [vmem:[#allocation2] sm:$0xff] %v63_v8  ;;  %68 = vst [vmem:[#allocation2 + $0x8] sm:$0xff] %v64_v9 }
  0x1f   :  { %69 = vst [vmem:[#allocation2 + $0x10] sm:$0xff] %v65_v10  ;;  %70 = vst [vmem:[#allocation2 + $0x18] sm:$0xff] %v66_v12 }
  0x20 PF:  { %p150_p9 = scmp.ge.s32.totalorder %s264_s0, 32 }
  0x21   :  { %v75_v13 = vlaneseq (!%p150_p9)  ;;  %v82_v14 = vstv (!%p150_p9), %s264_s0 }
  0x22   :  { %74 = sbr.rel (%p150_p9) target bundleno = 45 (0x2d), region = 21 }
  0x23   :  { %v76_v15 = vshrl.u32 (!%p150_p9), %v75_v13, 7 }
  0x25   :  { %v91_v16 = vld [vmem:[#allocation2] sm:$0xff] (!%p150_p9)  ;;  %vm83_vm0 = vcmp.lt.s32.totalorder (!%p150_p9), %v76_v15, %v82_v14  ;;  %v77_v17 = vadd.s32 (!%p150_p9), 8, %v76_v15  ;;  %v78_v18 = vadd.s32 (!%p150_p9), 16, %v76_v15  ;;  %v79_v19 = vadd.s32 (!%p150_p9), 24, %v76_v15  ;;  %v92_v21 = vld [vmem:[#allocation2 + $0x8] sm:$0xff] (!%p150_p9) }
  0x26   :  { %v87_v20 = vsel (!%p150_p9), %vm83_vm0, %v45_v1, 0.0  ;;  %v93_v22 = vld [vmem:[#allocation2 + $0x10] sm:$0xff] (!%p150_p9)  ;;  %v94_v23 = vld [vmem:[#allocation2 + $0x18] sm:$0xff] (!%p150_p9) }
  0x27   :  { %v99_v24 = vadd.f32 (!%p150_p9), %v91_v16, %v87_v20  ;;  %vm84_vm1 = vcmp.lt.s32.totalorder (!%p150_p9), %v77_v17, %v82_v14  ;;  %vm85_vm2 = vcmp.lt.s32.totalorder (!%p150_p9), %v78_v18, %v82_v14  ;;  %vm86_vm3 = vcmp.lt.s32.totalorder (!%p150_p9), %v79_v19, %v82_v14 }
  0x28   :  { %v88_v25 = vsel (!%p150_p9), %vm84_vm1, %v46_v2, 0.0  ;;  %v89_v26 = vsel (!%p150_p9), %vm85_vm2, %v47_v3, 0.0  ;;  %v90_v27 = vsel (!%p150_p9), %vm86_vm3, %v48_v4, 0.0 }
  0x29   :  { %103 = vst [vmem:[#allocation2] sm:$0xff] %v99_v24  ;;  %v100_v28 = vadd.f32 %v92_v21, %v88_v25  ;;  %v101_v29 = vadd.f32 %v93_v22, %v89_v26  ;;  %v102_v30 = vadd.f32 %v94_v23, %v90_v27 }
  0x2b   :  { %104 = vst [vmem:[#allocation2 + $0x8] sm:$0xff] %v100_v28  ;;  %105 = vst [vmem:[#allocation2 + $0x10] sm:$0xff] %v101_v29 }
  0x2c   :  { %106 = vst [vmem:[#allocation2 + $0x18] sm:$0xff] %v102_v30 }
  0x2d PF:  { %s123_s30 = scvt.s32.f32 %s264_s0  ;;  %s212_s3 = smov [#allocation8]  }
  0x2e   :  { %s136_s4 = sshll.u32 %s212_s3, 4  ;;  %s137_s4 = int_to_ptr.vmem [resolvable:$true] %s136_s4 }
  0x2f   :  { %v124_v31 = vstv %s123_s30  ;;  %s182_s5 = scalar_lea.vmem %s137_s4, 16  ;;  %s186_s6 = scalar_lea.vmem %s137_s4, 32 }
  0x30   :  { %158 = vrcp.f32 %v124_v31  ;;  %p183_p10 = scmp.ne.s32.totalorder %s137_s4, %s182_s5  ;;  %p187_p11 = scmp.lt.s32.totalorder %s137_s4, %s137_s4 }
  0x31   :  { %p188_p12 = scmp.lt.s32.totalorder %s186_s6, %s182_s5 }
  0x32   :  { %v111_v34 = vld [vmem:[#allocation2 + $0x8] sm:$0xff]  ;;  %v112_v36 = vld [vmem:[#allocation2 + $0x10] sm:$0xff] }
  0x33   :  { %v113_v38 = vld [vmem:[#allocation2 + $0x18] sm:$0xff]  ;;  %p189_p13 = por %p188_p12, %p187_p11 }
  0x34   :  { %v110_v33 = vld [vmem:[#allocation2] sm:$0xff] }
  0x35   :  { %v114_v35 = vadd.f32 %v111_v34, %v110_v33  ;;  %p190_p0 = pnand %p189_p13, %p183_p10 }
  0x37   :  { %v115_v37 = vadd.f32 %v114_v35, %v112_v36 }
  0x39   :  { %v116_v39 = vadd.f32 %v115_v37, %v113_v38 }
  0x3a   :  { %v159_v32 = vpop.eup %158 }
  0x3b   :  { %151 = vpush %v159_v32  ;;  %v117_v40 = vrot.slane %v116_v39, 4 }
  0x3d   :  { %v118_v41 = vadd.f32 %v117_v40, %v116_v39 }
  0x3f   :  { %v119_v42 = vrot.slane %v118_v41, 2 }
  0x41   :  { %v120_v43 = vadd.f32 %v119_v42, %v118_v41 }
  0x43   :  { %v121_v44 = vrot.slane %v120_v43, 1 }
  0x45   :  { %v122_v45 = vadd.f32 %v121_v44, %v120_v43 }
  0x6c   :  { %s152_s0 = spop %151 }
  0x6d   :  { %v127_v46 = vstv %s152_s0 }
  0x6e   :  { %v128_v47 = vmul.f32 %v127_v46, %v122_v45 }
  0x70   :  { %129 = vst [vmem:[#allocation8] sm:$0x1] %v128_v47 }
  0x71   :  { %193 = shalt.err (!%p190_p0)
}
  0x72   :  { %s194_s9 = scalar_lea.hbm %s266_s2, 16 }
  0x73   :  { %p195_p1 = scmp.ne.s32.totalorder %s266_s2, %s194_s9  ;;  %p198_p2 = scmp.lt.u32.totalorder %s194_s9, %s266_s2 }
  0x75   :  { %p200_p3 = pnand %p198_p2, %p195_p1 }
  0x77   :  { %203 = shalt.err (!%p200_p3)
}
  0x78   :  { %139 = dma.vmem_to_hbm [thread:$0]  %s137_s4, 16, %s266_s2, [#allocation7]  }
  0x79   :  { %206 = dma.done.wait [#allocation7], 16  }
  0x7a   :  { %207 = vsyncadd [#allocation7], 4294967280 }
  0x7b   :  { %143 = vsyncpa [#allocation6], 1 }
  0x7c   :  { %144 = vsyncpa [#allocation7], 1 }

</bundles_post_ra>
